<compile_context>
chip_gen: v7x
topology: tpu7x:2x2x1
jax: 0.10.0
libtpu: 0.0.40
codegen_flags: <defaults>
</compile_context>

<pallas_src>
import jax
import jax.numpy as jnp
from jax.experimental import pallas as pl
from jax.experimental.pallas import tpu as pltpu

LANES = 128  # pad hidden/output feature dims to one MXU/vreg lane tile


def nn_reg_kernel(x_ref, w1_ref, b1_ref, w2_ref, b2_ref, o_ref):
    # bf16 operands into the MXU, f32 accumulation; elementwise math in f32.
    x = x_ref[...].astype(jnp.bfloat16)
    h = jnp.dot(x, w1_ref[...], preferred_element_type=jnp.float32) + b1_ref[...]
    h = jnp.maximum(h, 0.0)
    y = jnp.dot(h.astype(jnp.bfloat16), w2_ref[...],
                preferred_element_type=jnp.float32) + b2_ref[...]
    # NOTE: the PyTorch module applies ReLU to the final layer too (see spec).
    o_ref[...] = jnp.maximum(y, 0.0).astype(o_ref.dtype)


def nn_reg_forward(x, w1, b1, w2, b2, output_dim, tm=256):
    """x: (batch, input_dim) f32.  w1/w2 bf16 padded to 128 lanes, b1/b2 f32 (1, 128)."""
    batch, in_dim = x.shape
    hd_pad = w1.shape[1]
    od_pad = w2.shape[1]

    # Batch tile: multiple of 8 sublanes, capped at `tm`; pad batch to a multiple.
    tm = min(tm, max(8, ((batch + 7) // 8) * 8))
    n_blocks = pl.cdiv(batch, tm)
    padded_batch = n_blocks * tm
    if padded_batch != batch:
        x = jnp.pad(x, ((0, padded_batch - batch), (0, 0)))

    out = pl.pallas_call(
        nn_reg_kernel,
        out_shape=jax.ShapeDtypeStruct((padded_batch, od_pad), jnp.float32),
        grid=(n_blocks,),
        in_specs=[
            pl.BlockSpec((tm, in_dim), lambda i: (i, 0)),       # x tile
            pl.BlockSpec((in_dim, hd_pad), lambda i: (0, 0)),   # w1 (resident)
            pl.BlockSpec((1, hd_pad), lambda i: (0, 0)),        # b1 (resident)
            pl.BlockSpec((hd_pad, od_pad), lambda i: (0, 0)),   # w2 (resident)
            pl.BlockSpec((1, od_pad), lambda i: (0, 0)),        # b2 (resident)
        ],
        out_specs=pl.BlockSpec((tm, od_pad), lambda i: (i, 0)),
        compiler_params=pltpu.CompilerParams(
            dimension_semantics=("parallel",),
            vmem_limit_bytes=32 * 1024 * 1024,
        ),
    )(x, w1, b1, w2, b2)

    # Strip batch padding and the lane padding of the output features.
    return out[:batch, :output_dim]


def xavier_uniform(key, fan_in, fan_out):
    # matches torch.nn.init.xavier_uniform_ semantics (gain=1)
    bound = (6.0 / (fan_in + fan_out)) ** 0.5
    # stored as (fan_in, fan_out) == transpose of the PyTorch (out, in) weight
    return jax.random.uniform(
        key, (fan_in, fan_out), jnp.float32, minval=-bound, maxval=bound
    )


def init_params(key, input_dim, hidden_dim, output_dim):
    """Returns lane-padded params: w1 (in, 128) bf16, b1 (1, 128) f32,
    w2 (128, 128) bf16, b2 (1, 128) f32.  Padded entries are zero so the
    padded lanes stay exactly zero through ReLU and never leak."""
    k1, k2, k3, k4 = jax.random.split(key, 4)
    w1 = xavier_uniform(k1, input_dim, hidden_dim)
    w2 = xavier_uniform(k2, hidden_dim, output_dim)
    # PyTorch Linear bias default init: U(-1/sqrt(fan_in), 1/sqrt(fan_in))
    # (NN_REG.init_weights only re-inits weights, not biases).
    b1_bound = 1.0 / (input_dim ** 0.5)
    b2_bound = 1.0 / (hidden_dim ** 0.5)
    b1 = jax.random.uniform(k3, (1, hidden_dim), jnp.float32, -b1_bound, b1_bound)
    b2 = jax.random.uniform(k4, (1, output_dim), jnp.float32, -b2_bound, b2_bound)

    hd_pad = max(LANES, ((hidden_dim + LANES - 1) // LANES) * LANES)
    od_pad = max(LANES, ((output_dim + LANES - 1) // LANES) * LANES)

    w1_p = jnp.zeros((input_dim, hd_pad), jnp.float32).at[:, :hidden_dim].set(w1)
    b1_p = jnp.zeros((1, hd_pad), jnp.float32).at[:, :hidden_dim].set(b1)
    w2_p = jnp.zeros((hd_pad, od_pad), jnp.float32).at[:hidden_dim, :output_dim].set(w2)
    b2_p = jnp.zeros((1, od_pad), jnp.float32).at[:, :output_dim].set(b2)

    # Weights feed the MXU in bf16; biases stay f32 for the VPU add.
    return w1_p.astype(jnp.bfloat16), b1_p, w2_p.astype(jnp.bfloat16), b2_p


if __name__ == "__main__":
    input_dim, hidden_dim, output_dim = 32, 5, 4
    batch = 8

    key = jax.random.PRNGKey(0)
    k_x, k_p = jax.random.split(key)
    x = jax.random.normal(k_x, (batch, input_dim), jnp.float32)
    w1, b1, w2, b2 = init_params(k_p, input_dim, hidden_dim, output_dim)

    out = nn_reg_forward(x, w1, b1, w2, b2, output_dim)
    jax.block_until_ready(out)

    # Reference in plain JAX, using the same bf16-rounded operands with f32
    # accumulation so it matches the kernel's numerics.
    xb = x.astype(jnp.bfloat16).astype(jnp.float32)
    w1f = w1[:, :hidden_dim].astype(jnp.float32)
    b1f = b1[0, :hidden_dim]
    w2f = w2[:hidden_dim, :output_dim].astype(jnp.float32)
    b2f = b2[0, :output_dim]
    h = jnp.maximum(xb @ w1f + b1f, 0.0)
    hb = h.astype(jnp.bfloat16).astype(jnp.float32)
    ref = jnp.maximum(hb @ w2f + b2f, 0.0)

    assert out.shape == (batch, output_dim)
    assert jnp.allclose(out, ref, atol=1e-3, rtol=1e-3), (
        f"max abs err {jnp.max(jnp.abs(out - ref))}")

    print("KERNEL_OK")
</pallas_src>

<mosaic_0001>
module attributes {stable_mosaic.version = 11 : i64} {
  func.func @nn_reg_kernel(%arg0: i32, %arg1: memref<8x32xf32, #tpu.memory_space<vmem>>, %arg2: memref<32x128xbf16, #tpu.memory_space<vmem>>, %arg3: memref<1x128xf32, #tpu.memory_space<vmem>>, %arg4: memref<128x128xbf16, #tpu.memory_space<vmem>>, %arg5: memref<1x128xf32, #tpu.memory_space<vmem>>, %arg6: memref<8x128xf32, #tpu.memory_space<vmem>>) attributes {dimension_semantics = [#tpu.dimension_semantics<parallel>], iteration_bounds = array<i64: 1>, scalar_prefetch = 0 : i64, scratch_operands = 0 : i64, tpu.core_type = #tpu.core_type<tc>, window_params = [{transform_indices = @transform_0, window_bounds = array<i64: 8, 32>}, {pipeline_mode = #tpu.pipeline_mode<synchronous>, transform_indices = @transform_1, window_bounds = array<i64: 32, 128>}, {pipeline_mode = #tpu.pipeline_mode<synchronous>, transform_indices = @transform_2, window_bounds = array<i64: 1, 128>}, {pipeline_mode = #tpu.pipeline_mode<synchronous>, transform_indices = @transform_3, window_bounds = array<i64: 128, 128>}, {pipeline_mode = #tpu.pipeline_mode<synchronous>, transform_indices = @transform_4, window_bounds = array<i64: 1, 128>}, {transform_indices = @transform_5, window_bounds = array<i64: 8, 128>}]} {
    %c0 = arith.constant 0 : index
    %c0_0 = arith.constant 0 : index
    %0 = vector.load %arg1[%c0, %c0_0] : memref<8x32xf32, #tpu.memory_space<vmem>>, vector<8x32xf32>
    %1 = arith.truncf %0 : vector<8x32xf32> to vector<8x32xbf16>
    %c0_1 = arith.constant 0 : index
    %c0_2 = arith.constant 0 : index
    %2 = vector.load %arg2[%c0_1, %c0_2] : memref<32x128xbf16, #tpu.memory_space<vmem>>, vector<32x128xbf16>
    %cst = arith.constant dense<0.000000e+00> : vector<8x128xf32>
    %3 = tpu.matmul %1, %2, %cst {dimension_numbers = #tpu.dot_dimension_numbers<[1], [0], [0], [1], [0, 0, 1, 1], [], []>} : vector<8x32xbf16>, vector<32x128xbf16>, vector<8x128xf32> -> vector<8x128xf32>
    %c0_3 = arith.constant 0 : index
    %c0_4 = arith.constant 0 : index
    %4 = vector.load %arg3[%c0_3, %c0_4] : memref<1x128xf32, #tpu.memory_space<vmem>>, vector<1x128xf32>
    %5 = vector.broadcast %4 : vector<1x128xf32> to vector<8x128xf32>
    %6 = arith.addf %3, %5 : vector<8x128xf32>
    %cst_5 = arith.constant 0.000000e+00 : f32
    %7 = vector.broadcast %cst_5 : f32 to vector<8x128xf32>
    %8 = arith.maximumf %6, %7 : vector<8x128xf32>
    %9 = arith.truncf %8 : vector<8x128xf32> to vector<8x128xbf16>
    %c0_6 = arith.constant 0 : index
    %c0_7 = arith.constant 0 : index
    %10 = vector.load %arg4[%c0_6, %c0_7] : memref<128x128xbf16, #tpu.memory_space<vmem>>, vector<128x128xbf16>
    %cst_8 = arith.constant dense<0.000000e+00> : vector<8x128xf32>
    %11 = tpu.matmul %9, %10, %cst_8 {dimension_numbers = #tpu.dot_dimension_numbers<[1], [0], [0], [1], [0, 0, 1, 1], [], []>} : vector<8x128xbf16>, vector<128x128xbf16>, vector<8x128xf32> -> vector<8x128xf32>
    %c0_9 = arith.constant 0 : index
    %c0_10 = arith.constant 0 : index
    %12 = vector.load %arg5[%c0_9, %c0_10] : memref<1x128xf32, #tpu.memory_space<vmem>>, vector<1x128xf32>
    %13 = vector.broadcast %12 : vector<1x128xf32> to vector<8x128xf32>
    %14 = arith.addf %11, %13 : vector<8x128xf32>
    %cst_11 = arith.constant 0.000000e+00 : f32
    %15 = vector.broadcast %cst_11 : f32 to vector<8x128xf32>
    %16 = arith.maximumf %14, %15 : vector<8x128xf32>
    %c0_12 = arith.constant 0 : index
    %c0_13 = arith.constant 0 : index
    %17 = vector.load %arg6[%c0_12, %c0_13] : memref<8x128xf32, #tpu.memory_space<vmem>>, vector<8x128xf32>
    tpu.vector_store %arg6[%c0_12, %c0_13], %16 {strides = array<i32>} : memref<8x128xf32, #tpu.memory_space<vmem>>, vector<8x128xf32>,
    return
  }
  func.func @transform_0(%arg0: i32) -> (i32, i32) {
    %c0_i32 = arith.constant 0 : i32
    %c0_i32_0 = arith.constant 0 : i32
    return %arg0, %c0_i32 : i32, i32
  }
  func.func @transform_1(%arg0: i32) -> (i32, i32) {
    %c0_i32 = arith.constant 0 : i32
    %c0_i32_0 = arith.constant 0 : i32
    %c0_i32_1 = arith.constant 0 : i32
    return %c0_i32, %c0_i32_0 : i32, i32
  }
  func.func @transform_2(%arg0: i32) -> (i32, i32) {
    %c0_i32 = arith.constant 0 : i32
    %c0_i32_0 = arith.constant 0 : i32
    %c0_i32_1 = arith.constant 0 : i32
    return %c0_i32, %c0_i32_0 : i32, i32
  }
  func.func @transform_3(%arg0: i32) -> (i32, i32) {
    %c0_i32 = arith.constant 0 : i32
    %c0_i32_0 = arith.constant 0 : i32
    %c0_i32_1 = arith.constant 0 : i32
    return %c0_i32, %c0_i32_0 : i32, i32
  }
  func.func @transform_4(%arg0: i32) -> (i32, i32) {
    %c0_i32 = arith.constant 0 : i32
    %c0_i32_0 = arith.constant 0 : i32
    %c0_i32_1 = arith.constant 0 : i32
    return %c0_i32, %c0_i32_0 : i32, i32
  }
  func.func @transform_5(%arg0: i32) -> (i32, i32) {
    %c0_i32 = arith.constant 0 : i32
    %c0_i32_0 = arith.constant 0 : i32
    return %arg0, %c0_i32 : i32, i32
  }
}

</mosaic_0001>

<bundles_post_ra>
// kernel: tpu_custom_call.1
= control target key start
LH: loop header
LB: loop body
LE: loop exit
PB: predicated region body
PF: predicated region fallthrough
CT: control target
= control target key end

     0   :  { %10 = vsyncpa [#allocation3], 0  ;;  %s524_s0 = inlined_call_operand.hbm [shape: f32[8,32], index: 0, kind: input, shape index: {}]   ;;  %s525_s1 = inlined_call_operand.hbm [shape: bf16[32,128], index: 1, kind: input, shape index: {}]   ;;  %s526_s2 = inlined_call_operand.vmem [shape: f32[1,128], index: 2, kind: input, shape index: {}]   ;;  %s527_s3 = inlined_call_operand.hbm [shape: bf16[128,128], index: 3, kind: input, shape index: {}]   ;;  %s528_s4 = inlined_call_operand.vmem [shape: f32[1,128], index: 4, kind: input, shape index: {}]   ;;  %s529_s5 = inlined_call_operand.hbm [shape: f32[8,128], index: 5, kind: output, shape index: {}]  }
   0x1   :  { %11 = vsyncpa [#allocation6], 0 }
   0x2   :  { %12 = vsyncpa [#allocation4], 0  ;;  %s426_s18 = smov [#allocation5]   ;;  %s332_s22 = scalar_lea.hbm %s525_s1, 256 }
   0x3   :  { %s28_s19 = sshll.u32 %s426_s18, 4  ;;  %p333_p0 = scmp.ne.s32.totalorder %s525_s1, %s332_s22  ;;  %s29_s19 = int_to_ptr.vmem [resolvable:$true] %s28_s19 }
   0x4   :  { %p336_p1 = scmp.lt.u32.totalorder %s332_s22, %s525_s1 }
   0x6   :  { %p338_p2 = pnand %p336_p1, %p333_p0 }
   0x8   :  { %341 = shalt.err (!%p338_p2)
}
   0x9   :  { %s342_s27 = scalar_lea.vmem %s29_s19, 256  ;;  %p347_p4 = scmp.lt.s32.totalorder %s29_s19, %s29_s19 }
   0xa   :  { %p343_p3 = scmp.ne.s32.totalorder %s29_s19, %s342_s27  ;;  %p348_p5 = scmp.lt.s32.totalorder %s342_s27, %s342_s27 }
   0xc   :  { %p349_p6 = por %p348_p5, %p347_p4 }
   0xe   :  { %p350_p7 = pnand %p349_p6, %p343_p3 }
  0x10   :  { %353 = shalt.err (!%p350_p7)
}
  0x11   :  { %s427_s28 = smov 64   ;;  %s428_s29 = smov 4  }
  0x12   :  { %34 = dma.hbm_to_vmem [thread:$0]  %s525_s1, 256, %s29_s19, [#allocation6], %s427_s28, %s427_s28, %s428_s29  }
  0x13   :  { %s429_s7 = smov [#allocation2]   ;;  %s430_s9 = smov [#allocation7]  }
  0x14   :  { %s19_s8 = sshll.u32 %s429_s7, 4  ;;  %s42_s10 = sshll.u32 %s430_s9, 4  ;;  %s20_s8 = int_to_ptr.vmem [resolvable:$true] %s19_s8  ;;  %s43_s10 = int_to_ptr.vmem [resolvable:$true] %s42_s10 }
  0x15   :  { %s354_s13 = scalar_lea.hbm %s524_s0, 128 }
  0x16   :  { %p355_p8 = scmp.ne.s32.totalorder %s524_s0, %s354_s13  ;;  %p358_p9 = scmp.lt.u32.totalorder %s354_s13, %s524_s0 }
  0x18   :  { %p360_p10 = pnand %p358_p9, %p355_p8 }
  0x1a   :  { %363 = shalt.err (!%p360_p10)
}
  0x1b   :  { %s364_s1 = scalar_lea.vmem %s20_s8, 128  ;;  %p369_p12 = scmp.lt.s32.totalorder %s20_s8, %s20_s8 }
  0x1c   :  { %p365_p11 = scmp.ne.s32.totalorder %s20_s8, %s364_s1  ;;  %p370_p13 = scmp.lt.s32.totalorder %s364_s1, %s364_s1 }
  0x1e   :  { %p371_p0 = por %p370_p13, %p369_p12 }
  0x20   :  { %p372_p1 = pnand %p371_p0, %p365_p11 }
  0x22   :  { %375 = shalt.err (!%p372_p1)
}
  0x23   :  { %22 = dma.hbm_to_vmem [thread:$0]  %s524_s0, 128, %s20_s8, [#allocation3]  }
  0x24   :  { %s376_s22 = scalar_lea.hbm %s527_s3, 1024 }
  0x25   :  { %p377_p2 = scmp.ne.s32.totalorder %s527_s3, %s376_s22  ;;  %p380_p3 = scmp.lt.u32.totalorder %s376_s22, %s527_s3 }
  0x27   :  { %p382_p4 = pnand %p380_p3, %p377_p2 }
  0x29   :  { %385 = shalt.err (!%p382_p4)
}
  0x2a   :  { %s386_s27 = scalar_lea.vmem %s43_s10, 1024  ;;  %p391_p6 = scmp.lt.s32.totalorder %s43_s10, %s43_s10 }
  0x2b   :  { %p387_p5 = scmp.ne.s32.totalorder %s43_s10, %s386_s27  ;;  %p392_p7 = scmp.lt.s32.totalorder %s386_s27, %s386_s27 }
  0x2d   :  { %p393_p8 = por %p392_p7, %p391_p6 }
  0x2f   :  { %p394_p9 = pnand %p393_p8, %p387_p5 }
  0x31   :  { %397 = shalt.err (!%p394_p9)
}
  0x32   :  { %48 = dma.hbm_to_vmem [thread:$0]  %s527_s3, 1024, %s43_s10, [#allocation6], %s427_s28, %s427_s28, %s428_s29  }
  0x33   :  { %420 = dma.done.wait [#allocation3], 128  }
  0x34   :  { %421 = vsyncadd [#allocation3], 4294967168 }
  0x35   :  { %422 = dma.done.wait [#allocation6], 1280  }
  0x36   :  { %423 = vsyncadd [#allocation6], 4294966016  ;;  %v431_v0 = vmov 0.0   ;;  %vm432_vm0 = vmmov 0   ;;  %v322_v1 = vld [vmem:[#allocation5] sm:$0xff]   ;;  %v323_v2 = vld [vmem:[#allocation5 + $0x8] sm:$0xff]  }
  0x37   :  { %286 = vmatprep.subr.bf16.mxu0 %v431_v0  ;;  %290 = vmatprep.mubr.msk.bf16.mxu0 %vm432_vm0, %v431_v0  ;;  %v61_v3 = vld [vmem:[#allocation2] sm:$0xff]  ;;  %v324_v4 = vld [vmem:[#allocation7] sm:$0xff]   ;;  %vm86_vm1 = vcmask 261120   ;;  %v326_v7 = vld [vmem:[#allocation7 + $0x10] sm:$0xff]   ;;  %s433_s7 = smov [#allocation8]  }
  0x38   :  { %294 = vmatprep.subr.bf16.mxu1 %v431_v0  ;;  %310 = vmatprep.mubr.msk.bf16.mxu1 %vm432_vm0, %v431_v0  ;;  %v62_v5 = vpack.c.bf16 %v61_v3, %v61_v3  ;;  %v325_v6 = vld [vmem:[#allocation7 + $0x8] sm:$0xff]   ;;  %v327_v8 = vld [vmem:[#allocation7 + $0x18] sm:$0xff]   ;;  %v328_v9 = vld [vmem:[#allocation7 + $0x20] sm:$0xff]   ;;  %s251_s8 = sshll.u32 %s433_s7, 4  ;;  %s252_s8 = int_to_ptr.vmem [resolvable:$true] %s251_s8 }
  0x39   :  { %287 = vmatpush3.bf16.msra.mxu0 %v322_v1  ;;  %295 = vmatpush3.bf16.msra.mxu1 %v324_v4  ;;  %v329_v10 = vld [vmem:[#allocation7 + $0x28] sm:$0xff]   ;;  %v330_v11 = vld [vmem:[#allocation7 + $0x30] sm:$0xff]   ;;  %v331_v12 = vld [vmem:[#allocation7 + $0x38] sm:$0xff]   ;;  %p403_p11 = scmp.lt.s32.totalorder %s252_s8, %s252_s8 }
  0x3a   :  { %288 = vmatprep.subr.bf16.mxu0 %v431_v0  ;;  %296 = vmatprep.subr.bf16.mxu1 %v431_v0  ;;  %v261_v13 = vld [vmem:[%s526_s2] ss:$0 sm:$0xff]  ;;  %s398_s2 = scalar_lea.vmem %s252_s8, 128 }
  0x3b   :  { %v265_v21 = vld [vmem:[%s528_s4] ss:$0 sm:$0xff]  ;;  %p399_p10 = scmp.ne.s32.totalorder %s252_s8, %s398_s2  ;;  %p404_p12 = scmp.lt.s32.totalorder %s398_s2, %s398_s2 }
  0x3d   :  { %289 = vmatpush3.bf16.msra.mxu0 %v323_v2  ;;  %297 = vmatpush3.bf16.msra.mxu1 %v325_v6  ;;  %p405_p13 = por %p404_p12, %p403_p11 }
  0x3e   :  { %298 = vmatprep.subr.bf16.mxu1 %v431_v0 }
  0x3f   :  { %p406_p0 = pnand %p405_p13, %p399_p10 }
  0x40   :  { %291 = vmatmul.mubr.msk.bf16.vlgmr.msra.gmra.mrb[0].mxu0 %vm86_vm1, %v62_v5 }
  0x41   :  { %299 = vmatpush3.bf16.msra.mxu1 %v326_v7 }
  0x42   :  { %300 = vmatprep.subr.bf16.mxu1 %v431_v0 }
  0x45   :  { %301 = vmatpush3.bf16.msra.mxu1 %v327_v8 }
  0x46   :  { %302 = vmatprep.subr.bf16.mxu1 %v431_v0 }
  0x49   :  { %303 = vmatpush3.bf16.msra.mxu1 %v328_v9 }
  0x4a   :  { %304 = vmatprep.subr.bf16.mxu1 %v431_v0 }
  0x4d   :  { %305 = vmatpush3.bf16.msra.mxu1 %v329_v10 }
  0x4e   :  { %306 = vmatprep.subr.bf16.mxu1 %v431_v0 }
  0x51   :  { %307 = vmatpush3.bf16.msra.mxu1 %v330_v11 }
  0x52   :  { %308 = vmatprep.subr.bf16.mxu1 %v431_v0 }
  0x55   :  { %309 = vmatpush3.bf16.msra.mxu1 %v331_v12 }
 0x113   :  { %v124_v14 = vpop.f32.mrb[0].mxu0 }
 0x114   :  { %v125_v15 = vadd.f32 %v261_v13, %v124_v14  ;;  %v292_v16 = vpop.f32.mrb[1].mxu0 }
 0x115   :  { %v127_v17 = vpop.f32.mrb[2].mxu0 }
 0x116   :  { %v130_v18 = vmax.f32 %v125_v15, 0.0  ;;  %v293_v19 = vpop.f32.mrb[3].mxu0 }
 0x118   :  { %v131_v20 = vpack.c.bf16 %v130_v18, %v130_v18 }
 0x11a   :  { %311 = vmatmul.mubr.bf16.vlgmr.msra.gmra.mrb[0].mxu1 %v131_v20 }
 0x1ed   :  { %v237_v22 = vpop.f32.mrb[0].mxu1 }
 0x1ee   :  { %v238_v23 = vadd.f32 %v265_v21, %v237_v22  ;;  %v312_v24 = vpop.f32.mrb[1].mxu1 }
 0x1ef   :  { %v240_v25 = vpop.f32.mrb[2].mxu1 }
 0x1f0   :  { %v243_v26 = vmax.f32 %v238_v23, 0.0  ;;  %v313_v27 = vpop.f32.mrb[3].mxu1 }
 0x1f2   :  { %244 = vst [vmem:[#allocation8] sm:$0xff] %v243_v26 }
 0x1f3   :  { %409 = shalt.err (!%p406_p0)
}
 0x1f4   :  { %s410_s4 = scalar_lea.hbm %s529_s5, 128 }
 0x1f5   :  { %p411_p1 = scmp.ne.s32.totalorder %s529_s5, %s410_s4  ;;  %p414_p2 = scmp.lt.u32.totalorder %s410_s4, %s529_s5 }
 0x1f7   :  { %p416_p3 = pnand %p414_p2, %p411_p1 }
 0x1f9   :  { %419 = shalt.err (!%p416_p3)
}
 0x1fa   :  { %254 = dma.vmem_to_hbm [thread:$0]  %s252_s8, 128, %s529_s5, [#allocation4]  }
 0x1fb   :  { %424 = dma.done.wait [#allocation4], 128  }
 0x1fc   :  { %425 = vsyncadd [#allocation4], 4294967168 }
 0x1fd   :  { %258 = vsyncpa [#allocation3], 1 }
 0x1fe   :  { %259 = vsyncpa [#allocation6], 1 }
 0x1ff   :  { %260 = vsyncpa [#allocation4], 1 }

</bundles_post_ra>
